<compile_context>
chip_gen: v7x
topology: tpu7x:2x2x1
jax: 0.10.0
libtpu: 0.0.40
codegen_flags: <defaults>
</compile_context>

<pallas_src>
import jax
import jax.numpy as jnp
from jax import lax
from jax.experimental import pallas as pl
from jax.experimental.pallas import tpu as pltpu


def _round_up(x, m):
    return (x + m - 1) // m * m


def _vmem_capacity_bytes():
    """Physical VMEM per TensorCore; conservative fallback if the query fails."""
    try:
        return int(pltpu.get_tpu_info().vmem_capacity_bytes)
    except Exception:
        return 64 * 2 ** 20          # v7x-sized fallback => safe on every generation


def _patch_proj_kernel(p_ref, w_ref, b_ref, o_ref):
    # p_ref: (tn, Kp) bf16   w_ref: (Kp, tD) bf16   b_ref: (1, tD) f32
    # o_ref: (tn, tD) out_dtype  -- f32 MXU accumulation, cast only at the store.
    acc = jnp.dot(p_ref[...], w_ref[...], preferred_element_type=jnp.float32)
    o_ref[...] = (acc + b_ref[...]).astype(o_ref.dtype)


def patch_proj_packed(packed, w_p, b_p, *, out_dtype=jnp.bfloat16,
                      vmem_budget_bytes=None, max_rows_per_tile=8192):
    """(rows, Kp) @ (Kp, Dp) + bias -> (rows, Dp) in `out_dtype`.

    Operands are expected already row/column packed so Kp and Dp are lane-dense
    (multiples of 128 whenever possible); see VideoPatchEmbed.__init__.
    """
    rows, Kp = packed.shape
    Kw, Dp = w_p.shape
    assert Kw == Kp and b_p.shape == (1, Dp)

    cb = jnp.dtype(packed.dtype).itemsize
    wbytes = jnp.dtype(w_p.dtype).itemsize
    ob = jnp.dtype(out_dtype).itemsize

    if vmem_budget_bytes is None:
        # ~96 MiB on v5e/v6e (128 MiB physical), ~48 MiB on v7x (64 MiB).
        vmem_budget_bytes = (_vmem_capacity_bytes() * 3) // 4
    vmem_budget_bytes = int(vmem_budget_bytes)

    # ---- optional D tiling: keep the resident weight block <= ~budget/4 ----
    tD = Dp
    while tD > 128 and 2 * Kp * tD * wbytes > vmem_budget_bytes // 4:
        tD = max(128, _round_up(tD // 2, 128))
    grid_d = pl.cdiv(Dp, tD)

    # Grid-invariant weight (grid_d == 1) only needs a single VMEM buffer.
    single_buffer_w = (grid_d == 1) and (Kp * tD * wbytes >= (2 << 20))
    w_bufs = 1 if single_buffer_w else 2
    weight_bytes = w_bufs * Kp * tD * wbytes + 2 * tD * 4     # + double-buffered bias

    # ---- row tile from the VMEM budget (double-buffered in/out tiles) ----
    bytes_per_row = Kp * cb + tD * ob
    tn_cap = max(16, (vmem_budget_bytes - weight_bytes) // (2 * bytes_per_row))
    tn = int(max(16, min(max_rows_per_tile, (tn_cap // 16) * 16)))
    if rows <= tn:
        if rows >= 32:
            # Split into >= 2 row tiles so both v7x TensorCores get work under
            # "parallel" semantics (harmless on single-core v5e/v6e).
            tn = _round_up(pl.cdiv(rows, 2), 16)
        else:
            tn = rows            # block dim == full array dim is always legal
    grid_n = pl.cdiv(rows, tn)   # partial last block is masked by Pallas (no jnp.pad)

    w_spec_kwargs = {}
    if single_buffer_w:
        w_spec_kwargs["pipeline_mode"] = pl.Buffered(1)
    in_specs = [
        pl.BlockSpec((tn, Kp), lambda i, j: (i, 0)),
        pl.BlockSpec((Kp, tD), lambda i, j: (0, j), **w_spec_kwargs),
        pl.BlockSpec((1, tD), lambda i, j: (0, j)),
    ]
    out_spec = pl.BlockSpec((tn, tD), lambda i, j: (i, j))

    need = 2 * tn * bytes_per_row + weight_bytes
    vmem_limit = int(max(min(need + (8 << 20), vmem_budget_bytes), 32 << 20))

    cost = pl.CostEstimate(
        flops=2 * rows * Kp * Dp,
        transcendentals=0,
        bytes_accessed=(rows * Kp * cb + grid_n * Kp * Dp * wbytes
                        + Dp * 4 + rows * Dp * ob),
    )

    return pl.pallas_call(
        _patch_proj_kernel,
        out_shape=jax.ShapeDtypeStruct((rows, Dp), out_dtype),
        grid=(grid_n, grid_d),
        in_specs=in_specs,
        out_specs=out_spec,
        compiler_params=pltpu.CompilerParams(
            dimension_semantics=("parallel", "parallel"),
            vmem_limit_bytes=vmem_limit,
        ),
        cost_estimate=cost,
    )(packed, w_p, b_p)


class VideoPatchEmbed:
    """JAX/Pallas port of the PyTorch VideoPatchEmbed module.

    __call__ matches the torch Conv2d contract (B*F, D, H/P, W/P) NCHW.
    Transformer consumers should use _tokens() -> (B*F, nH*nW, D) directly:
    the final NCHW transpose is a full extra HBM pass that
    SpaceTimeTransformer.forward_features immediately undoes.
    """

    def __init__(self, img_size=16, patch_size=4, in_chans=4, embed_dim=32,
                 num_frames=4, key=None, compute_dtype=jnp.bfloat16,
                 out_dtype=jnp.bfloat16):
        self.img_size = (img_size, img_size)
        self.patch_size = (patch_size, patch_size)
        self.num_frames = num_frames
        self.embed_dim = embed_dim
        self.in_chans = in_chans
        self.num_patches = (img_size // patch_size) ** 2 * num_frames
        self.compute_dtype = compute_dtype
        self.out_dtype = out_dtype

        if key is None:
            key = jax.random.PRNGKey(0)
        kw, kb = jax.random.split(key)
        # Conv2d weight: (D, C, P, P); bias: (D,)  (deterministic init)
        fan_in = in_chans * patch_size * patch_size
        limit = (1.0 / fan_in) ** 0.5
        self.conv_w = jax.random.uniform(
            kw, (embed_dim, in_chans, patch_size, patch_size),
            minval=-limit, maxval=limit, dtype=jnp.float32)
        self.conv_b = jax.random.uniform(
            kb, (embed_dim,), minval=-limit, maxval=limit, dtype=jnp.float32)

        # ---- packed projection operands, built ONCE (not per forward) ----
        D, K = embed_dim, fan_in
        if D % 128 == 0:
            r = 1
        elif 128 % D == 0:
            r = 128 // D             # row-pack r patches per lane-dense vreg row
        else:
            r = 1                    # TODO(synk): D not aligned to 128 -> masked tail lanes
        self._r = r
        w_flat = self.conv_w.reshape(D, K).T                       # (K, D), (c,ph,pw) order
        self._w_flat = w_flat.astype(compute_dtype)
        self._b_flat = self.conv_b.astype(jnp.float32).reshape(1, D)
        if r > 1:
            # Block-diagonal weight: W_bd[j*K + k, j*D + d] = w[k, d]
            eye = jnp.eye(r, dtype=w_flat.dtype)
            w_bd = (eye[:, None, :, None] * w_flat[None, :, None, :]).reshape(r * K, r * D)
            self._w_packed = w_bd.astype(compute_dtype)
            self._b_packed = jnp.tile(self.conv_b.astype(jnp.float32), (r,)).reshape(1, r * D)
        else:
            self._w_packed, self._b_packed = self._w_flat, self._b_flat

    def _tokens(self, x):
        """(B, F, C, H, W) -> (B*F, nH*nW, D) token embeddings (out_dtype).

        This is the layout SpaceTimeTransformer.forward_features consumes
        (it does .flatten(2).transpose(2, 1) right after the conv), so using it
        directly skips the NHWC->NCHW transpose entirely.
        """
        B, F, C, H, W = x.shape
        assert F <= self.num_frames and C == self.in_chans
        P = self.patch_size[0]
        nH, nW = H // P, W // P
        D = self.embed_dim
        K = C * P * P
        N = B * F * nH * nW

        # Patchify. Kept as ONE XLA transpose fusion with the f32->bf16 convert
        # folded in (read f32 once, write bf16 once).
        # TODO(synk): fold this reorder into the Pallas kernel itself
        # (BlockSpec over (BF-tile, C, P, W) + in-VMEM reorder); rank-6
        # transposes with P-sized minor dims do not lower reliably in Mosaic,
        # so the reorder stays on the XLA side for now.
        x6 = x.reshape(B * F, C, nH, P, nW, P).transpose(0, 2, 4, 1, 3, 5)
        patches = x6.astype(self.compute_dtype).reshape(N, K)     # (N, K)

        r = self._r
        if r > 1 and N % r == 0:
            packed = patches.reshape(N // r, r * K)                # free bitcast
            out_p = patch_proj_packed(packed, self._w_packed, self._b_packed,
                                      out_dtype=self.out_dtype)
            out = out_p.reshape(N, D)                              # free bitcast
        else:
            out = patch_proj_packed(patches, self._w_flat, self._b_flat,
                                    out_dtype=self.out_dtype)
        return out.reshape(B * F, nH * nW, D)

    def __call__(self, x):
        # Matches the torch Conv2d output layout: (B*F, D, H/P, W/P), NCHW.
        # NOTE: prefer _tokens(); this transpose is pure HBM overhead.
        B, F, C, H, W = x.shape
        P = self.patch_size[0]
        nH, nW = H // P, W // P
        tokens = self._tokens(x)
        return tokens.reshape(B * F, nH, nW, self.embed_dim).transpose(0, 3, 1, 2)


if __name__ == "__main__":
    key = jax.random.PRNGKey(0)
    k_x, k_p = jax.random.split(key)

    B, F, C, H, W = 2, 4, 4, 16, 16
    module = VideoPatchEmbed(img_size=16, patch_size=4, in_chans=C,
                             embed_dim=32, num_frames=F, key=k_p)
    x = jax.random.normal(k_x, (B, F, C, H, W), dtype=jnp.float32)

    tokens = jax.block_until_ready(module._tokens(x))
    assert tokens.shape == (B * F, (H // 4) * (W // 4), 32)

    out = jax.block_until_ready(module(x))            # Conv2d contract, NCHW
    assert out.shape == (B * F, 32, H // 4, W // 4)
    out_f32 = out.astype(jnp.float32)

    # Reference 1: same bf16-rounded inputs, f32 conv.  Remaining difference is
    # only the bf16 output rounding + accumulation order.
    xb = x.astype(jnp.bfloat16).astype(jnp.float32)
    w_bf = module.conv_w.astype(jnp.bfloat16).astype(jnp.float32)
    ref_bf16 = lax.conv_general_dilated(
        xb.reshape(B * F, C, H, W), w_bf,
        window_strides=module.patch_size, padding="VALID",
        dimension_numbers=("NCHW", "OIHW", "NCHW"),
    ) + module.conv_b.reshape(1, -1, 1, 1)
    assert jnp.allclose(out_f32, ref_bf16, atol=1e-2, rtol=1e-2)

    # Reference 2: full-f32 conv (looser tolerance: bf16 in/out rounding).
    ref_f32 = lax.conv_general_dilated(
        x.reshape(B * F, C, H, W), module.conv_w,
        window_strides=module.patch_size, padding="VALID",
        dimension_numbers=("NCHW", "OIHW", "NCHW"),
    ) + module.conv_b.reshape(1, -1, 1, 1)
    assert jnp.allclose(out_f32, ref_f32, atol=5e-2, rtol=5e-2)

    # Token layout check, rearranged the way forward_features does
    # (flatten(2).transpose(2, 1)).
    ref_tokens = ref_bf16.reshape(B * F, 32, -1).transpose(0, 2, 1)
    assert jnp.allclose(tokens.astype(jnp.float32), ref_tokens, atol=1e-2, rtol=1e-2)

    print("KERNEL_OK")
</pallas_src>

<mosaic_0001>
module attributes {stable_mosaic.version = 11 : i64} {
  func.func @_patch_proj_kernel(%arg0: i32, %arg1: i32, %arg2: memref<16x256xbf16, #tpu.memory_space<vmem>>, %arg3: memref<256x128xbf16, #tpu.memory_space<vmem>>, %arg4: memref<1x128xf32, #tpu.memory_space<vmem>>, %arg5: memref<16x128xbf16, #tpu.memory_space<vmem>>) attributes {dimension_semantics = [#tpu.dimension_semantics<parallel>, #tpu.dimension_semantics<parallel>], iteration_bounds = array<i64: 2, 1>, scalar_prefetch = 0 : i64, scratch_operands = 0 : i64, tpu.core_type = #tpu.core_type<tc>, window_params = [{transform_indices = @transform_0, window_bounds = array<i64: 16, 256>}, {transform_indices = @transform_1, window_bounds = array<i64: 256, 128>}, {transform_indices = @transform_2, window_bounds = array<i64: 1, 128>}, {transform_indices = @transform_3, window_bounds = array<i64: 16, 128>}]} {
    %c0 = arith.constant 0 : index
    %c0_0 = arith.constant 0 : index
    %0 = vector.load %arg2[%c0, %c0_0] : memref<16x256xbf16, #tpu.memory_space<vmem>>, vector<16x256xbf16>
    %c0_1 = arith.constant 0 : index
    %c0_2 = arith.constant 0 : index
    %1 = vector.load %arg3[%c0_1, %c0_2] : memref<256x128xbf16, #tpu.memory_space<vmem>>, vector<256x128xbf16>
    %cst = arith.constant dense<0.000000e+00> : vector<16x128xf32>
    %2 = tpu.matmul %0, %1, %cst {dimension_numbers = #tpu.dot_dimension_numbers<[1], [0], [0], [1], [0, 0, 1, 1], [], []>} : vector<16x256xbf16>, vector<256x128xbf16>, vector<16x128xf32> -> vector<16x128xf32>
    %c0_3 = arith.constant 0 : index
    %c0_4 = arith.constant 0 : index
    %3 = vector.load %arg4[%c0_3, %c0_4] : memref<1x128xf32, #tpu.memory_space<vmem>>, vector<1x128xf32>
    %4 = vector.broadcast %3 : vector<1x128xf32> to vector<16x128xf32>
    %5 = arith.addf %2, %4 : vector<16x128xf32>
    %6 = arith.truncf %5 : vector<16x128xf32> to vector<16x128xbf16>
    %c0_5 = arith.constant 0 : index
    %c0_6 = arith.constant 0 : index
    %7 = vector.load %arg5[%c0_5, %c0_6] : memref<16x128xbf16, #tpu.memory_space<vmem>>, vector<16x128xbf16>
    tpu.vector_store %arg5[%c0_5, %c0_6], %6 {strides = array<i32>} : memref<16x128xbf16, #tpu.memory_space<vmem>>, vector<16x128xbf16>,
    return
  }
  func.func @transform_0(%arg0: i32, %arg1: i32) -> (i32, i32) {
    %c0_i32 = arith.constant 0 : i32
    %c0_i32_0 = arith.constant 0 : i32
    return %arg0, %c0_i32 : i32, i32
  }
  func.func @transform_1(%arg0: i32, %arg1: i32) -> (i32, i32) {
    %c0_i32 = arith.constant 0 : i32
    %c0_i32_0 = arith.constant 0 : i32
    return %c0_i32, %arg1 : i32, i32
  }
  func.func @transform_2(%arg0: i32, %arg1: i32) -> (i32, i32) {
    %c0_i32 = arith.constant 0 : i32
    %c0_i32_0 = arith.constant 0 : i32
    return %c0_i32, %arg1 : i32, i32
  }
  func.func @transform_3(%arg0: i32, %arg1: i32) -> (i32, i32) {
    %c0_i32 = arith.constant 0 : i32
    return %arg0, %arg1 : i32, i32
  }
}

</mosaic_0001>

<bundles_post_ra>
// kernel: tpu_custom_call.1
= control target key start
LH: loop header
LB: loop body
LE: loop exit
PB: predicated region body
PF: predicated region fallthrough
CT: control target
= control target key end

     0   :  { %8 = vsyncpa [#allocation3], 0  ;;  %s1135_s0 = inlined_call_operand.hbm [shape: bf16[32,256], index: 0, kind: input, shape index: {}]   ;;  %s1136_s1 = inlined_call_operand.hbm [shape: bf16[256,128], index: 1, kind: input, shape index: {}]   ;;  %s1137_s2 = inlined_call_operand.vmem [shape: f32[1,128], index: 2, kind: input, shape index: {}]   ;;  %s1138_s3 = inlined_call_operand.hbm [shape: bf16[32,128], index: 3, kind: output, shape index: {}]  }
   0x1   :  { %10 = vsyncpa [#allocation3 + $0x1], 0 }
   0x2   :  { %11 = vsyncpa [#allocation6], 0 }
   0x3   :  { %12 = vsyncpa [#allocation4], 0 }
   0x4   :  { %14 = vsyncpa [#allocation4 + $0x1], 0  ;;  %s908_s12 = smov 0   ;;  %s910_s13 = smov 0  }
   0x5   :  { %s912_s14 = smov 0   ;;  %s914_s15 = smov 0  }
   0x6   :  { %s916_s16 = smov 0   ;;  %s918_s17 = smov 0  }
   0x7 LB: > { %s563_s18 = sadd.s32 4294967295, %s877_s17   ;;  %s564_s19 = sadd.s32 4294967294, %s877_s17   ;;  %s877_s17 = sphi %s918_s17, %s20_s17   ;;  %s873_s16 = sphi %s916_s16, %s1162_s16   ;;  %s869_s15 = sphi %s914_s15, %s1161_s15   ;;  %s865_s14 = sphi %s912_s14, %s1160_s14   ;;  %s861_s13 = sphi %s910_s13, %s1159_s13   ;;  %s857_s12 = sphi %s908_s12, %s1158_s12  }
   0x8   : > { %p52_p0 = scmp.ne.s32.totalorder %s861_s13, %s857_s12  ;;  %p942_p1 = scmp.eq.s32.totalorder %s563_s18, 0 }
   0x9   : > { %p946_p2 = scmp.eq.s32.totalorder %s563_s18, 1  ;;  %p136_p3 = scmp.eq.s32.totalorder %s564_s19, 1 }
   0xa   : > { %s1143_s20 = scalar_select %p942_p1, 1, 0 }
   0xb   : > { %s1144_s21 = scalar_select %p946_p2, 1, 0 }
   0xc   : > { %p952_p4 = por %p942_p1, %p52_p0  ;;  %p565_p5 = scmp.ge.s32.totalorder %s877_s17, 1 }
   0xd   : > { %p957_p6 = por %p136_p3, %p52_p0  ;;  %p143_p7 = scmp.lt.s32.totalorder %s877_s17, 3 }
   0xe   : > { %s1145_s22 = scalar_select %p952_p4, 1, 0 }
   0xf   : > { %s1146_s23 = scalar_select %p957_p6, 1, 0 }
  0x10   : > { %p962_p8 = pnand %p565_p5, %p143_p7  ;;  %s879_s25 = smov [#allocation5]  }
  0x11   : > { %s157_s26 = sshll.u32 %s879_s25, 4  ;;  %s32_s28 = sadd.s32 1, %s873_s16  ;;  %s158_s26 = int_to_ptr.vmem [resolvable:$true] %s157_s26 }
  0x12   : > { %s1147_s24 = scalar_select %p962_p8, 1, 0 }
  0x13   : > { %p643_p9 = pneg %p962_p8  ;;  %s733_s4 = scalar_lea.hbm %s1136_s1, 2048 }
  0x14   : > { %p734_p12 = scmp.ne.s32.totalorder %s1136_s1, %s733_s4  ;;  %p740_p5 = scmp.lt.u32.totalorder %s733_s4, %s1136_s1 }
  0x15   : > { %p971_p11 = pnand %p643_p9, %p942_p1 }
  0x17   : > { %p735_p13 = pneg %p971_p11 }
  0x19   : > { %p736_p0 = pnand %p735_p13, %p734_p12 }
  0x1b   : > { %p737_p3 = pneg %p736_p0 }
  0x1d   : > { %p742_p7 = pnand %p740_p5, %p737_p3 }
  0x1f   : > { %745 = shalt.err (!%p742_p7)
}
  0x20   : > { %s746_s9 = scalar_lea.vmem %s158_s26, 2048  ;;  %p754_p1 = scmp.lt.s32.totalorder %s158_s26, %s158_s26 }
  0x21   : > { %p747_p9 = scmp.ne.s32.totalorder %s158_s26, %s746_s9  ;;  %p755_p4 = scmp.lt.s32.totalorder %s746_s9, %s746_s9 }
  0x23   : > { %p749_p10 = pnand %p747_p9, %p735_p13  ;;  %p756_p8 = por %p755_p4, %p754_p1 }
  0x25   : > { %p750_p6 = pneg %p749_p10 }
  0x27   : > { %p757_p2 = pnand %p756_p8, %p750_p6 }
  0x29   : > { %760 = shalt.err (!%p757_p2)
}
  0x2a   : > { %s880_s10 = smov 64   ;;  %s881_s11 = smov 4  }
  0x2b   : > { %646 = dma.hbm_to_vmem [thread:$0]  (!%p971_p11), %s1136_s1, 2048, %s158_s26, [#allocation6], %s880_s10, %s880_s10, %s881_s11  }
  0x2c   : > { %p34_p1 = scmp.ge.s32.totalorder %s32_s28, 2  ;;  %s39_s25 = sadd.s32 1, %s865_s14 }
  0x2d   : > { %p46_p2 = scmp.ne.s32.totalorder %s865_s14, %s861_s13  ;;  %p47_p4 = scmp.eq.s32.totalorder %s877_s17, 0 }
  0x2e   : > { %s1164_s28 = smov (%p34_p1, %s32_s28), 0  ;;  %p1150_p8 = scmp.ne.s32.totalorder %s1144_s21, 0 }
  0x2f   : > { %p998_p6 = por %p47_p4, %p46_p2  ;;  %s36_s27 = ssub.s32 %s873_s16, %s1164_s28 }
  0x30   : > { %p1004_p10 = por %p1150_p8, %p46_p2  ;;  %p656_p12 = scmp.lt.s32.totalorder %s877_s17, 2 }
  0x31   : > { %p37_p11 = scmp.eq.s32.totalorder %s36_s27, 0  ;;  %s177_s26 = sand.u32 1, %s865_s14  }
  0x32   : > { %s569_s4 = sshll.u32 %s177_s26, 4  ;;  %s604_s6 = sshll.u32 %s873_s16, 8 }
  0x33   : > { %s1013_s5 = scalar_select %p37_p11, %s865_s14, %s39_s25  }
  0x34   : > { %s1019_s9 = scalar_lea.hbm %s1135_s0, %s604_s6  ;;  %s181_s21 = scalar_lea.vmem [#allocation2], %s569_s4 }
  0x35   : > { %s189_s10 = sshll.u32 %s181_s21, 4  ;;  %p1025_p13 = pnand %p656_p12, %p998_p6  ;;  %s1021_s10 = int_to_ptr.vmem [resolvable:$true] %s189_s10 }
  0x36   : > { %s1029_s18 = scalar_lea.sflag [#allocation3], %s177_s26  ;;  %s761_s19 = scalar_lea.hbm %s1019_s9, 256 }
  0x37   : > { %p762_p0 = scmp.ne.s32.totalorder %s1019_s9, %s761_s19  ;;  %p763_p3 = pneg %p1025_p13 }
  0x38   : > { %s766_s29 = scalar_lea.hbm %s1135_s0, 512  ;;  %p767_p9 = scmp.lt.u32.totalorder %s1019_s9, %s1135_s0 }
  0x39   : > { %p764_p5 = pnand %p763_p3, %p762_p0  ;;  %p768_p1 = scmp.lt.u32.totalorder %s766_s29, %s761_s19 }
  0x3a   : > { %p770_p4 = scmp.lt.u32.totalorder %s761_s19, %s1019_s9 }
  0x3b   : > { %p765_p7 = pneg %p764_p5  ;;  %p769_p2 = por %p768_p1, %p767_p9 }
  0x3d   : > { %p771_p6 = por %p770_p4, %p769_p2 }
  0x3f   : > { %p772_p8 = pnand %p771_p6, %p765_p7 }
  0x41   : > { %775 = shalt.err (!%p772_p8)
}
  0x42   : > { %s776_s26 = scalar_lea.vmem %s1021_s10, 256  ;;  %s882_s7 = smov [#allocation2]  }
  0x43   : > { %p777_p12 = scmp.ne.s32.totalorder %s1021_s10, %s776_s26  ;;  %s781_s8 = sshll.u32 %s882_s7, 4  ;;  %s782_s8 = int_to_ptr.vmem [resolvable:$false] %s781_s8 }
  0x44   : > { %s783_s21 = scalar_lea.vmem %s782_s8, 512  ;;  %p784_p5 = scmp.lt.s32.totalorder %s1021_s10, %s782_s8 }
  0x45   : > { %p779_p11 = pnand %p777_p12, %p763_p3  ;;  %p785_p9 = scmp.lt.s32.totalorder %s783_s21, %s776_s26 }
  0x47   : > { %p780_p0 = pneg %p779_p11  ;;  %p786_p1 = por %p785_p9, %p784_p5 }
  0x49   : > { %p787_p2 = pnand %p786_p1, %p780_p0 }
  0x4b   : > { %790 = shalt.err (!%p787_p2)
}
  0x4c   : > { %s883_s19 = smov 128   ;;  %s884_s25 = smov 8  }
  0x4d   : > { %650 = dma.hbm_to_vmem [thread:$0]  (!%p1025_p13), %s1019_s9, 256, %s1021_s10, %s1029_s18, %s883_s19, %s883_s19, %s884_s25  }
  0x4e   : > { %p1153_p3 = scmp.ne.s32.totalorder %s1147_s24, 0 }
  0x4f   : > { %s1060_s27 = sand.u32 (!%p1153_p3), 1, %s861_s13   ;;  %p1154_p7 = scmp.ne.s32.totalorder (!%p1153_p3), %s1145_s22, 0 }
  0x50   : > { %201 = sbr.rel (%p1153_p3) target bundleno = 360 (0x168), region = 32  ;;  %s574_s29 = sshll.u32 (!%p1153_p3), %s1060_s27, 4 }
  0x51   : > { %s204_s4 = scalar_lea.sflag (!%p1153_p3), [#allocation3], %s1060_s27  ;;  %s1064_s6 = scalar_lea.vmem (!%p1153_p3), [#allocation2], %s574_s29 }
  0x57   : > { %844 = dma.done.wait (%p1154_p7), %s204_s4, 256  }
  0x58   : > { %846 = vsyncadd (%p1154_p7), %s204_s4, 4294967040  ;;  %p1155_p13 = scmp.ne.s32.totalorder %s1143_s20, 0 }
  0x5a   : > { %848 = dma.done.wait (%p1155_p13), [#allocation6], 2048  }
  0x5b   : > { %850 = vsyncadd (%p1155_p13), [#allocation6], 4294965248  ;;  %v714_v0 = vld [vmem:[#allocation5 + $0x40] sm:$0xff]   ;;  %v716_v2 = vld [vmem:[#allocation5 + $0x48] sm:$0xff]   ;;  %s576_s20 = sshll.u32 %s1060_s27, 3  ;;  %s607_s9 = sshll.u32 %s869_s15, 7 }
  0x5c   : > { %v715_v1 = vld [vmem:[#allocation5] sm:$0xff]   ;;  %613 = vmatprep.subr.bf16.mxu0 %v714_v0  ;;  %v717_v3 = vld [vmem:[#allocation5 + $0x8] sm:$0xff]   ;;  %v718_v4 = vld [vmem:[#allocation5 + $0x50] sm:$0xff]   ;;  %s236_s10 = scalar_lea.vmem [#allocation7], %s576_s20  ;;  %s1084_s7 = scalar_lea.hbm %s1138_s3, %s607_s9 }
  0x5d   : > { %614 = vmatpush3.bf16.msra.mxu0 %v715_v1  ;;  %v719_v5 = vld [vmem:[#allocation5 + $0x10] sm:$0xff]   ;;  %v720_v6 = vld [vmem:[#allocation5 + $0x58] sm:$0xff]   ;;  %v722_v8 = vld [vmem:[#allocation5 + $0x60] sm:$0xff]   ;;  %s456_s11 = sshll.u32 %s236_s10, 4  ;;  %s442_s8 = scalar_lea.sflag [#allocation4], %s1060_s27  ;;  %s1086_s11 = int_to_ptr.vmem [resolvable:$true] %s456_s11 }
  0x5e   : > { %615 = vmatprep.subr.bf16.mxu0 %v716_v2  ;;  %v721_v7 = vld [vmem:[#allocation5 + $0x18] sm:$0xff]   ;;  %v723_v9 = vld [vmem:[#allocation5 + $0x20] sm:$0xff]   ;;  %v724_v10 = vld [vmem:[#allocation5 + $0x68] sm:$0xff]   ;;  %s791_s21 = scalar_lea.vmem %s1086_s11, 128  ;;  %s885_s15 = smov [#allocation7]  }
  0x5f   : > { %v732_v11 = vld [vmem:[%s1064_s6 + $0x4] ss:$8 sps:$4 sm:$0xff]   ;;  %v730_v17 = vld [vmem:[%s1064_s6] ss:$8 sps:$4 sm:$0xff]   ;;  %p792_p4 = scmp.ne.s32.totalorder %s1086_s11, %s791_s21  ;;  %s795_s19 = sshll.u32 %s885_s15, 4  ;;  %s796_s19 = int_to_ptr.vmem [resolvable:$false] %s795_s19 }
  0x60   : > { %v725_v12 = vld [vmem:[#allocation5 + $0x28] sm:$0xff]   ;;  %422 = vmatprep.mubr.bf16.mxu0 %v732_v11  ;;  %v726_v13 = vld [vmem:[#allocation5 + $0x70] sm:$0xff]   ;;  %v728_v15 = vld [vmem:[#allocation5 + $0x78] sm:$0xff]   ;;  %s797_s25 = scalar_lea.vmem %s796_s19, 256  ;;  %p798_p12 = scmp.lt.s32.totalorder %s1086_s11, %s796_s19 }
  0x61   : > { %616 = vmatpush3.bf16.msra.mxu0 %v717_v3  ;;  %v727_v14 = vld [vmem:[#allocation5 + $0x30] sm:$0xff]   ;;  %v729_v16 = vld [vmem:[#allocation5 + $0x38] sm:$0xff]   ;;  %v577_v22 = vld [vmem:[%s1137_s2] ss:$0 sm:$0xff]  ;;  %p793_p6 = pnand %p792_p4, %p1004_p10  ;;  %p799_p11 = scmp.lt.s32.totalorder %s797_s25, %s791_s21 }
  0x62   : > { %617 = vmatprep.subr.bf16.mxu0 %v718_v4 }
  0x63   : > { %p794_p8 = pneg %p793_p6  ;;  %p800_p0 = por %p799_p11, %p798_p12 }
  0x65   : > { %618 = vmatpush3.bf16.msra.mxu0 %v719_v5  ;;  %p801_p5 = pnand %p800_p0, %p794_p8 }
  0x66   : > { %619 = vmatprep.subr.bf16.mxu0 %v720_v6 }
  0x69   : > { %620 = vmatpush3.bf16.msra.mxu0 %v721_v7 }
  0x6a   : > { %621 = vmatprep.subr.bf16.mxu0 %v722_v8 }
  0x6d   : > { %622 = vmatpush3.bf16.msra.mxu0 %v723_v9 }
  0x6e   : > { %623 = vmatprep.subr.bf16.mxu0 %v724_v10 }
  0x71   : > { %624 = vmatpush3.bf16.msra.mxu0 %v725_v12 }
  0x72   : > { %625 = vmatprep.subr.bf16.mxu0 %v726_v13 }
  0x75   : > { %626 = vmatpush3.bf16.msra.mxu0 %v727_v14 }
  0x76   : > { %627 = vmatprep.subr.bf16.mxu0 %v728_v15 }
  0x79   : > { %628 = vmatpush3.bf16.msra.mxu0 %v729_v16 }
  0x7c   : > { %423 = vmatmul.mubr.bf16.vlgmr.msra.gmra.mrb[0].mxu0 %v730_v17 }
 0x14f   : > { %v629_v18 = vpop.f32.mrb[0].mxu0 }
 0x150   : > { %v630_v19 = vpop.f32.mrb[1].mxu0 }
 0x151   : > { %v631_v20 = vadd.f32 %v630_v19, %v629_v18  ;;  %v632_v21 = vpop.f32.mrb[2].mxu0 }
 0x152   : > { %v633_v23 = vpop.f32.mrb[3].mxu0 }
 0x153   : > { %v634_v24 = vadd.f32 %v633_v23, %v632_v21  ;;  %v425_v25 = vadd.f32 %v631_v20, %v577_v22 }
 0x155   : > { %v428_v26 = vadd.f32 %v634_v24, %v577_v22 }
 0x157   : > { %v611_v27 = vpack.c.bf16 %v428_v26, %v425_v25 }
 0x159   : > { %612 = vst [vmem:[%s236_s10] sm:$0xff] %v611_v27  }
 0x15a   : > { %804 = shalt.err (!%p801_p5)
}
 0x15b   : > { %s805_s29 = scalar_lea.hbm %s1084_s7, 128  ;;  %s809_s20 = scalar_lea.hbm %s1138_s3, 256 }
 0x15c   : > { %p806_p9 = scmp.ne.s32.totalorder %s1084_s7, %s805_s29  ;;  %p810_p3 = scmp.lt.u32.totalorder %s1084_s7, %s1138_s3 }
 0x15d   : > { %p811_p7 = scmp.lt.u32.totalorder %s809_s20, %s805_s29  ;;  %p813_p4 = scmp.lt.u32.totalorder %s805_s29, %s1084_s7 }
 0x15e   : > { %p807_p1 = pnand %p806_p9, %p1004_p10 }
 0x15f   : > { %p812_p13 = por %p811_p7, %p810_p3 }
 0x160   : > { %p808_p2 = pneg %p807_p1 }
 0x161   : > { %p814_p6 = por %p813_p4, %p812_p13 }
 0x163   : > { %p815_p8 = pnand %p814_p6, %p808_p2 }
 0x165   : > { %818 = shalt.err (!%p815_p8)
}
 0x166   : > { %s886_s9 = smov 64   ;;  %s887_s10 = smov 4  }
 0x167   : > { %641 = dma.vmem_to_hbm [thread:$0]  (%p1004_p10), %s1086_s11, 128, %s1084_s7, %s442_s8, %s886_s9, %s886_s9, %s887_s10  }
 0x168 PF: > { %s471_s18 = sand.u32 1, %s857_s12   ;;  %p1156_p12 = scmp.ne.s32.totalorder %s1146_s23, 0 }
 0x169   : > { %p1157_p11 = scmp.ge.s32.totalorder %s877_s17, 2  ;;  %s472_s26 = scalar_lea.sflag [#allocation4], %s471_s18 }
 0x16b   : > { %p652_p0 = pnand %p1157_p11, %p1156_p12 }
 0x16d   : > { %852 = dma.done.wait (!%p652_p0), %s472_s26, 128  }
 0x16e   : > { %854 = vsyncadd (!%p652_p0), %s472_s26, 4294967168  ;;  %s20_s17 = sadd.s32 1, %s877_s17   ;;  %s1158_s12 = smov %s861_s13 }
 0x16f   : > { %p17_p5 = scmp.ge.s32.totalorder %s20_s17, 4   ;;  %s1159_s13 = smov %s865_s14 }
 0x170   : > { %s1160_s14 = smov %s1013_s5  ;;  %s1161_s15 = smov %s873_s16 }
 0x171   : > { %s1162_s16 = smov %s1164_s28  ;;  %19 = sbr.rel (!%p17_p5) target bundleno = 7 (0x7), region = 85 }
 0x178   :  { %477 = vsyncpa [#allocation3], 1 }
 0x179   :  { %479 = vsyncpa [#allocation3 + $0x1], 1 }
 0x17a   :  { %480 = vsyncpa [#allocation6], 1 }
 0x17b   :  { %481 = vsyncpa [#allocation4], 1 }
 0x17c   :  { %483 = vsyncpa [#allocation4 + $0x1], 1 }

</bundles_post_ra>
